<compile_context>
chip_gen: v5e
topology: v5e:2x2
jax: 0.10.0
libtpu: 0.0.40
codegen_flags: <defaults>
</compile_context>

<pallas_src>
import functools

import jax
import jax.numpy as jnp
from jax.experimental import pallas as pl
from jax.experimental.pallas import tpu as pltpu


_XW_RESIDENT_BUDGET = 12 * 1024 * 1024   # double-buffered bf16 XW slab bytes
_VMEM_LIMIT = 32 * 1024 * 1024           # scoped VMEM requested from Mosaic


def _round_up(x, m):
    return ((x + m - 1) // m) * m


# ----------------------------- Pallas kernels --------------------------------
def _xw_kernel(x_ref, w_ref, o_ref):
    # Feature transform XW = X @ W (computed once, reused by the aggregation).
    o_ref[...] = jnp.dot(
        x_ref[...], w_ref[...], preferred_element_type=jnp.float32
    ).astype(o_ref.dtype)


def _agg_kernel(a_ref, xw_ref, b_ref, o_ref, *, tk, xw_resident):
    # out = relu(A_hat @ XW + b) over a (row-tile, K-tile) grid.  K (the node
    # reduction axis) is the last grid axis and "arbitrary"; the output block
    # index is k-invariant, so the f32 output tile stays resident in VMEM and
    # serves directly as the accumulator (no extra scratch, no final copy).
    k = pl.program_id(1)

    @pl.when(k == 0)
    def _():
        o_ref[...] = jnp.zeros_like(o_ref)

    if xw_resident:
        # Whole XW lives in VMEM (constant block index); take this K slice.
        off = pl.multiple_of(k * tk, tk)
        xw = xw_ref[pl.ds(off, tk), :]
    else:
        xw = xw_ref[...]

    o_ref[...] += jnp.dot(a_ref[...], xw, preferred_element_type=jnp.float32)

    @pl.when(k == pl.num_programs(1) - 1)
    def _():
        o_ref[...] = jnp.maximum(o_ref[...] + b_ref[...], 0.0)


# ------------------------------ adjacency ------------------------------------
def build_normalized_adj(edge_index, num_nodes, padded_num_nodes=None,
                         dtype=jnp.float32):
    """Dense D^{-1/2} (A + I) D^{-1/2}, matching PyG gcn_norm (source->target).

    Built directly at `padded_num_nodes` and in `dtype`, so the kernel's
    dominant operand never goes through a separate pad/cast pass.  Padded
    rows/cols stay exactly zero (padded nodes have no edges or self-loops).
    """
    n_p = num_nodes if padded_num_nodes is None else padded_num_nodes
    row, col = edge_index[0], edge_index[1]          # row = source, col = target
    loop = jnp.arange(num_nodes, dtype=edge_index.dtype)
    row = jnp.concatenate([row, loop])
    col = jnp.concatenate([col, loop])
    ones = jnp.ones(row.shape[0], jnp.float32)
    deg = jnp.zeros((num_nodes,), jnp.float32).at[col].add(ones)
    dinv = jnp.where(deg > 0.0, jax.lax.rsqrt(deg), 0.0)
    norm = (dinv[row] * dinv[col]).astype(dtype)
    # out[target] = sum_edges norm * x[source]  ->  A_hat[target, source] += norm
    a_hat = jnp.zeros((n_p, n_p), dtype).at[col, row].add(norm)
    return a_hat


# ------------------------------ wrapper ---------------------------------------
def _pick_tiles(n):
    """Row tile tm and reduction tile tk, sized from the actual node count."""
    n_p0 = _round_up(n, 128)
    if n_p0 >= 1024:
        return 512, 1024
    if n_p0 >= 512:
        return 256, 512
    return n_p0, n_p0            # tiny node type: one tile, minimal padding


def gcn_conv_pallas(x, edge_index, w, b):
    """relu(A_hat @ X @ W + b) for one node type (tiled Pallas kernels)."""
    n, f_in = x.shape
    f_out = w.shape[1]

    cin_p = _round_up(f_in, 128)
    cout_p = _round_up(f_out, 128)
    tm, tk = _pick_tiles(n)
    n_p = _round_up(n, tk)                   # tm divides tk -> both divide n_p

    # Keep the full XW operand resident in VMEM (single DMA) when its
    # double-buffered bf16 slab fits the budget; otherwise stream K tiles.
    # With tn == cout_p the rest of the working set (A tile, f32 out tile,
    # bias) is ~2*tm*tk*2 + 2*tm*cout_p*4 bytes <= ~2.5 MiB for the largest
    # tiles at cout_p=128 — comfortably inside the 32 MiB limit on all chips.
    xw_resident = 2 * n_p * cout_p * 2 <= _XW_RESIDENT_BUDGET

    # Zero-padding is exact: padded nodes have no edges (zero A_hat rows/cols)
    # and padded channels multiply zero weights; we slice back at the end.
    a_p = build_normalized_adj(edge_index, n, padded_num_nodes=n_p,
                               dtype=jnp.bfloat16)
    x_p = jnp.zeros((n_p, cin_p), jnp.bfloat16).at[:n, :f_in].set(
        x.astype(jnp.bfloat16))
    w_p = jnp.zeros((cin_p, cout_p), jnp.bfloat16).at[:f_in, :f_out].set(
        w.astype(jnp.bfloat16))
    b_p = jnp.zeros((1, cout_p), jnp.float32).at[0, :f_out].set(
        b.astype(jnp.float32))

    # ---- kernel 1: XW = X @ W (hoisted out of the aggregation loop) ---------
    xw = pl.pallas_call(
        _xw_kernel,
        out_shape=jax.ShapeDtypeStruct((n_p, cout_p), jnp.bfloat16),
        grid=(n_p // tm,),
        in_specs=[
            pl.BlockSpec((tm, cin_p), lambda i: (i, 0)),
            pl.BlockSpec((cin_p, cout_p), lambda i: (0, 0)),
        ],
        out_specs=pl.BlockSpec((tm, cout_p), lambda i: (i, 0)),
        compiler_params=pltpu.CompilerParams(
            dimension_semantics=("parallel",)),
        cost_estimate=pl.CostEstimate(
            flops=2 * n_p * cin_p * cout_p,
            transcendentals=0,
            bytes_accessed=2 * (n_p * cin_p + cin_p * cout_p + n_p * cout_p)),
    )(x_p, w_p)

    # ---- kernel 2: out = relu(A_hat @ XW + b), single pass over A_hat -------
    if xw_resident:
        xw_spec = pl.BlockSpec((n_p, cout_p), lambda i, k: (0, 0))
    else:
        xw_spec = pl.BlockSpec((tk, cout_p), lambda i, k: (k, 0))

    out_p = pl.pallas_call(
        functools.partial(_agg_kernel, tk=tk, xw_resident=xw_resident),
        out_shape=jax.ShapeDtypeStruct((n_p, cout_p), jnp.float32),
        grid=(n_p // tm, n_p // tk),
        in_specs=[
            pl.BlockSpec((tm, tk), lambda i, k: (i, k)),
            xw_spec,
            pl.BlockSpec((1, cout_p), lambda i, k: (0, 0)),
        ],
        out_specs=pl.BlockSpec((tm, cout_p), lambda i, k: (i, 0)),
        compiler_params=pltpu.CompilerParams(
            dimension_semantics=("parallel", "arbitrary"),
            vmem_limit_bytes=_VMEM_LIMIT),
        cost_estimate=pl.CostEstimate(
            flops=2 * n_p * n_p * cout_p,
            transcendentals=0,
            bytes_accessed=(2 * n_p * n_p + 2 * n_p * cout_p
                            + 4 * cout_p + 4 * n_p * cout_p)),
    )(a_p, xw, b_p)

    return out_p[:n, :f_out]


# ------------------------------ JAX glue -------------------------------------
def init_params(in_channels_dict, out_channels, key):
    """Deterministic Glorot-uniform weights, zero bias (like PyG GCNConv reset)."""
    params = {}
    for obj_type, c_in in sorted(in_channels_dict.items()):
        key, sub = jax.random.split(key)
        limit = (6.0 / (c_in + out_channels)) ** 0.5
        w = jax.random.uniform(sub, (c_in, out_channels), jnp.float32,
                               minval=-limit, maxval=limit)
        b = jnp.zeros((out_channels,), jnp.float32)
        params[obj_type] = (w, b)
    return params


def hetero_gcn_forward(data, params):
    """data: {obj_type: {'x': [N, C_in], 'edge_index': [2, E]}}  ->  same dict
    with x replaced by relu(GCNConv(x, edge_index))."""
    # TODO(synk): batch the per-node-type loop into one pallas_call (leading
    # type axis + scalar-prefetched sizes) to amortize launch overhead when
    # there are many small node types.
    out = {}
    for obj_type, blob in data.items():
        x = blob["x"]
        edge_index = blob["edge_index"]
        w, b = params[obj_type]
        new_x = gcn_conv_pallas(x, edge_index, w, b)
        out[obj_type] = {"x": new_x, "edge_index": edge_index}
    return out


# ------------------------------- demo ----------------------------------------
if __name__ == "__main__":
    key = jax.random.PRNGKey(0)

    out_channels = 32
    # "unit": enough nodes to exercise the multi-tile row + K-accumulation
    # path; "city": tiny node type exercising the single-tile padded path.
    graph_spec = {"unit": (8, 600, 2400), "city": (16, 16, 48)}  # (c_in, N, E)

    params = init_params({t: c for t, (c, _, _) in graph_spec.items()},
                         out_channels, jax.random.PRNGKey(0))

    data = {}
    for obj_type, (c_in, n_nodes, n_edges) in sorted(graph_spec.items()):
        key, kx, ke = jax.random.split(key, 3)
        x = jax.random.normal(kx, (n_nodes, c_in), jnp.float32)
        edge_index = jax.random.randint(ke, (2, n_edges), 0, n_nodes,
                                        dtype=jnp.int32)
        data[obj_type] = {"x": x, "edge_index": edge_index}

    result = hetero_gcn_forward(data, params)

    for obj_type, blob in data.items():
        n_nodes = blob["x"].shape[0]
        got = result[obj_type]["x"]
        jax.block_until_ready(got)
        assert got.shape == (n_nodes, out_channels)
        assert bool(jnp.all(got >= 0.0))                 # ReLU applied
        # f32 plain-JAX reference (bf16 matmul inputs -> loose tolerance).
        w, b = params[obj_type]
        a_hat = build_normalized_adj(blob["edge_index"], n_nodes)
        ref = jnp.maximum(a_hat @ (blob["x"] @ w) + b, 0.0)
        assert bool(jnp.allclose(got, ref, atol=5e-2, rtol=5e-2))

    print("KERNEL_OK")
</pallas_src>

<mosaic_0001>
module attributes {stable_mosaic.version = 11 : i64} {
  func.func @_xw_kernel(%arg0: i32, %arg1: memref<128x128xbf16, #tpu.memory_space<vmem>>, %arg2: memref<128x128xbf16, #tpu.memory_space<vmem>>, %arg3: memref<128x128xbf16, #tpu.memory_space<vmem>>) attributes {dimension_semantics = [#tpu.dimension_semantics<parallel>], iteration_bounds = array<i64: 1>, scalar_prefetch = 0 : i64, scratch_operands = 0 : i64, tpu.core_type = #tpu.core_type<tc>, window_params = [{transform_indices = @transform_0, window_bounds = array<i64: 128, 128>}, {pipeline_mode = #tpu.pipeline_mode<synchronous>, transform_indices = @transform_1, window_bounds = array<i64: 128, 128>}, {transform_indices = @transform_2, window_bounds = array<i64: 128, 128>}]} {
    %c0 = arith.constant 0 : index
    %c0_0 = arith.constant 0 : index
    %0 = vector.load %arg1[%c0, %c0_0] : memref<128x128xbf16, #tpu.memory_space<vmem>>, vector<128x128xbf16>
    %c0_1 = arith.constant 0 : index
    %c0_2 = arith.constant 0 : index
    %1 = vector.load %arg2[%c0_1, %c0_2] : memref<128x128xbf16, #tpu.memory_space<vmem>>, vector<128x128xbf16>
    %cst = arith.constant dense<0.000000e+00> : vector<128x128xf32>
    %2 = tpu.matmul %0, %1, %cst {dimension_numbers = #tpu.dot_dimension_numbers<[1], [0], [0], [1], [0, 0, 1, 1], [], []>} : vector<128x128xbf16>, vector<128x128xbf16>, vector<128x128xf32> -> vector<128x128xf32>
    %3 = arith.truncf %2 : vector<128x128xf32> to vector<128x128xbf16>
    %c0_3 = arith.constant 0 : index
    %c0_4 = arith.constant 0 : index
    %4 = vector.load %arg3[%c0_3, %c0_4] : memref<128x128xbf16, #tpu.memory_space<vmem>>, vector<128x128xbf16>
    tpu.vector_store %arg3[%c0_3, %c0_4], %3 {strides = array<i32>} : memref<128x128xbf16, #tpu.memory_space<vmem>>, vector<128x128xbf16>,
    return
  }
  func.func @transform_0(%arg0: i32) -> (i32, i32) {
    %c0_i32 = arith.constant 0 : i32
    %c0_i32_0 = arith.constant 0 : i32
    return %arg0, %c0_i32 : i32, i32
  }
  func.func @transform_1(%arg0: i32) -> (i32, i32) {
    %c0_i32 = arith.constant 0 : i32
    %c0_i32_0 = arith.constant 0 : i32
    %c0_i32_1 = arith.constant 0 : i32
    return %c0_i32, %c0_i32_0 : i32, i32
  }
  func.func @transform_2(%arg0: i32) -> (i32, i32) {
    %c0_i32 = arith.constant 0 : i32
    %c0_i32_0 = arith.constant 0 : i32
    return %arg0, %c0_i32 : i32, i32
  }
}

</mosaic_0001>

<bundles_post_ra>
// kernel: tpu_custom_call.1
= control target key start
LH: loop header
LB: loop body
LE: loop exit
PB: predicated region body
PF: predicated region fallthrough
CT: control target
= control target key end

     0   :  { %7 = vsyncpa [#allocation3], 0  ;;  %s545_s0 = inlined_call_operand.hbm [shape: bf16[128,128], index: 0, kind: input, shape index: {}]   ;;  %s546_s1 = inlined_call_operand.hbm [shape: bf16[128,128], index: 1, kind: input, shape index: {}]   ;;  %s547_s2 = inlined_call_operand.hbm [shape: bf16[128,128], index: 2, kind: output, shape index: {}]  }
   0x1   :  { %8 = vsyncpa [#allocation6], 0 }
   0x2   :  { %9 = vsyncpa [#allocation4], 0  ;;  %s14_s11 = sshll.u32 %s545_s0, 4  ;;  %s507_s12 = smov [#allocation2]   ;;  %s15_s11 = int_to_ptr.hbm [resolvable:$true] %s14_s11 }
   0x3   :  { %s16_s13 = sshll.u32 %s507_s12, 4  ;;  %s27_s16 = sshll.u32 %s546_s1, 4  ;;  %s17_s13 = int_to_ptr.vmem [resolvable:$true] %s16_s13  ;;  %s28_s16 = int_to_ptr.hbm [resolvable:$true] %s27_s16 }
   0x4   :  { %s508_s17 = smov 64   ;;  %s509_s18 = smov 4  }
   0x5   :  { %22 = dma.hbm_to_vmem [thread:$0]  %s15_s11, 1024, %s17_s13, [#allocation3], %s508_s17, %s508_s17, %s509_s18  }
   0x6   :  { %s510_s19 = smov [#allocation5]  }
   0x7   :  { %s29_s20 = sshll.u32 %s510_s19, 4  ;;  %s30_s20 = int_to_ptr.vmem [resolvable:$true] %s29_s20 }
   0x8   :  { %35 = dma.hbm_to_vmem [thread:$0]  %s28_s16, 1024, %s30_s20, [#allocation6], %s508_s17, %s508_s17, %s509_s18  }
   0x9   :  { %501 = dma.done.wait [#allocation3], 1024  }
   0xa   :  { %502 = vsyncadd [#allocation3], 4294966272 }
   0xb   :  { %503 = dma.done.wait [#allocation6], 1024  }
   0xc   :  { %504 = vsyncadd [#allocation6], 4294966272  ;;  %v352_v0 = vld [vmem:[#allocation5 + $0x38] sm:$0xff]  ;;  %v351_v1 = vld [vmem:[#allocation5 + $0x30] sm:$0xff]  ;;  %s511_s0 = smov [#allocation7]   ;;  %s259_s23 = sshll.u32 %s547_s2, 4  ;;  %s260_s23 = int_to_ptr.hbm [resolvable:$true] %s259_s23 }
   0xd   :  { %172 = vmatpush.bf16.msra.mxu0 %v352_v0  ;;  %400 = vmatpush.bf16.msra.mxu1 %v352_v0  ;;  %v350_v2 = vld [vmem:[#allocation5 + $0x28] sm:$0xff]  ;;  %v349_v3 = vld [vmem:[#allocation5 + $0x20] sm:$0xff]  ;;  %v348_v4 = vld [vmem:[#allocation5 + $0x18] sm:$0xff]  ;;  %s257_s1 = sshll.u32 %s511_s0, 4  ;;  %s258_s1 = int_to_ptr.vmem [resolvable:$true] %s257_s1 }
   0xe   :  { %401 = vmatpush.bf16.msra.mxu2 %v352_v0  ;;  %402 = vmatpush.bf16.msra.mxu3 %v352_v0  ;;  %v347_v5 = vld [vmem:[#allocation5 + $0x10] sm:$0xff]  ;;  %v346_v6 = vld [vmem:[#allocation5 + $0x8] sm:$0xff]  ;;  %v345_v7 = vld [vmem:[#allocation5] sm:$0xff] }
   0xf   :  { %v337_v8 = vld [vmem:[#allocation2] sm:$0xff]  ;;  %v339_v9 = vld [vmem:[#allocation2 + $0x10] sm:$0xff]  ;;  %v338_v12 = vld [vmem:[#allocation2 + $0x8] sm:$0xff] }
  0x10   :  { %v341_v10 = vld [vmem:[#allocation2 + $0x20] sm:$0xff]  ;;  %v343_v11 = vld [vmem:[#allocation2 + $0x30] sm:$0xff]  ;;  %v340_v13 = vld [vmem:[#allocation2 + $0x18] sm:$0xff] }
  0x11   :  { %173 = vmatpush.bf16.msra.mxu0 %v351_v1  ;;  %403 = vmatpush.bf16.msra.mxu1 %v351_v1  ;;  %v342_v14 = vld [vmem:[#allocation2 + $0x28] sm:$0xff]  ;;  %v344_v15 = vld [vmem:[#allocation2 + $0x38] sm:$0xff] }
  0x12   :  { %404 = vmatpush.bf16.msra.mxu2 %v351_v1  ;;  %405 = vmatpush.bf16.msra.mxu3 %v351_v1 }
  0x15   :  { %174 = vmatpush.bf16.msra.mxu0 %v350_v2  ;;  %406 = vmatpush.bf16.msra.mxu1 %v350_v2 }
  0x16   :  { %407 = vmatpush.bf16.msra.mxu2 %v350_v2  ;;  %408 = vmatpush.bf16.msra.mxu3 %v350_v2 }
  0x19   :  { %175 = vmatpush.bf16.msra.mxu0 %v349_v3  ;;  %409 = vmatpush.bf16.msra.mxu1 %v349_v3 }
  0x1a   :  { %410 = vmatpush.bf16.msra.mxu2 %v349_v3  ;;  %411 = vmatpush.bf16.msra.mxu3 %v349_v3 }
  0x1d   :  { %176 = vmatpush.bf16.msra.mxu0 %v348_v4  ;;  %412 = vmatpush.bf16.msra.mxu1 %v348_v4 }
  0x1e   :  { %413 = vmatpush.bf16.msra.mxu2 %v348_v4  ;;  %414 = vmatpush.bf16.msra.mxu3 %v348_v4 }
  0x21   :  { %177 = vmatpush.bf16.msra.mxu0 %v347_v5  ;;  %415 = vmatpush.bf16.msra.mxu1 %v347_v5 }
  0x22   :  { %416 = vmatpush.bf16.msra.mxu2 %v347_v5  ;;  %417 = vmatpush.bf16.msra.mxu3 %v347_v5 }
  0x25   :  { %178 = vmatpush.bf16.msra.mxu0 %v346_v6  ;;  %418 = vmatpush.bf16.msra.mxu1 %v346_v6 }
  0x26   :  { %419 = vmatpush.bf16.msra.mxu2 %v346_v6  ;;  %420 = vmatpush.bf16.msra.mxu3 %v346_v6 }
  0x29   :  { %179 = vmatpush.bf16.msra.mxu0 %v345_v7  ;;  %421 = vmatpush.bf16.msra.mxu1 %v345_v7 }
  0x2a   :  { %422 = vmatpush.bf16.msra.mxu2 %v345_v7  ;;  %423 = vmatpush.bf16.msra.mxu3 %v345_v7 }
  0x2c   :  { %180 = vmatmul.bf16.vlgmr.msra.gmra.mxu0 %v337_v8  ;;  %190 = vmatmul.bf16.vlgmr.msra.gmra.mxu1 %v339_v9 }
  0x2d   :  { %200 = vmatmul.bf16.vlgmr.msra.gmra.mxu2 %v341_v10  ;;  %210 = vmatmul.bf16.vlgmr.msra.gmra.mxu3 %v343_v11 }
  0x3c   :  { %185 = vmatmul.bf16.gmra.mxu0 %v338_v12  ;;  %195 = vmatmul.bf16.gmra.mxu1 %v340_v13 }
  0x3d   :  { %205 = vmatmul.bf16.gmra.mxu2 %v342_v14  ;;  %215 = vmatmul.bf16.gmra.mxu3 %v344_v15 }
  0xa9   :  { %v181_v16 = vpop.f32.mrf.mxu0  ;;  %v191_v17 = vpop.f32.mrf.mxu1 }
  0xb0   :  { %v201_v18 = vpop.f32.mrf.mxu2  ;;  %v211_v19 = vpop.f32.mrf.mxu3 }
  0xb1   :  { %v183_v20 = vpop.f32.mrf.mxu0  ;;  %v193_v21 = vpop.f32.mrf.mxu1 }
  0xb2   :  { %v356_v22 = vpack.c.bf16 %v183_v20, %v181_v16  ;;  %v366_v23 = vpack.c.bf16 %v193_v21, %v191_v17 }
  0xb4   :  { %357 = vst [vmem:[#allocation7] sm:$0xff] %v356_v22  }
  0xb5   :  { %394 = vst [vmem:[#allocation7 + $0x10] sm:$0xff] %v366_v23  }
  0xb8   :  { %v203_v24 = vpop.f32.mrf.mxu2  ;;  %v213_v25 = vpop.f32.mrf.mxu3 }
  0xb9   :  { %v376_v26 = vpack.c.bf16 %v203_v24, %v201_v18  ;;  %v386_v27 = vpack.c.bf16 %v213_v25, %v211_v19  ;;  %v186_v28 = vpop.f32.mrf.mxu0  ;;  %v196_v29 = vpop.f32.mrf.mxu1 }
  0xbb   :  { %396 = vst [vmem:[#allocation7 + $0x20] sm:$0xff] %v376_v26  }
  0xbc   :  { %398 = vst [vmem:[#allocation7 + $0x30] sm:$0xff] %v386_v27  }
  0xc0   :  { %v206_v30 = vpop.f32.mrf.mxu2  ;;  %v216_v31 = vpop.f32.mrf.mxu3 }
  0xc1   :  { %v188_v32 = vpop.f32.mrf.mxu0  ;;  %v198_v33 = vpop.f32.mrf.mxu1 }
  0xc2   :  { %v361_v34 = vpack.c.bf16 %v188_v32, %v186_v28  ;;  %v371_v35 = vpack.c.bf16 %v198_v33, %v196_v29 }
  0xc4   :  { %393 = vst [vmem:[#allocation7 + $0x8] sm:$0xff] %v361_v34  }
  0xc5   :  { %395 = vst [vmem:[#allocation7 + $0x18] sm:$0xff] %v371_v35  }
  0xc8   :  { %v208_v36 = vpop.f32.mrf.mxu2  ;;  %v218_v37 = vpop.f32.mrf.mxu3 }
  0xc9   :  { %v381_v38 = vpack.c.bf16 %v208_v36, %v206_v30  ;;  %v391_v39 = vpack.c.bf16 %v218_v37, %v216_v31 }
  0xcb   :  { %397 = vst [vmem:[#allocation7 + $0x28] sm:$0xff] %v381_v38  }
  0xcc   :  { %399 = vst [vmem:[#allocation7 + $0x38] sm:$0xff] %v391_v39  }
  0xcd   :  { %265 = dma.vmem_to_hbm [thread:$0]  %s258_s1, 1024, %s260_s23, [#allocation4], %s508_s17, %s508_s17, %s509_s18  }
  0xce   :  { %505 = dma.done.wait [#allocation4], 1024  }
  0xcf   :  { %506 = vsyncadd [#allocation4], 4294966272 }
  0xd0   :  { %270 = vsyncpa [#allocation3], 1 }
  0xd1   :  { %271 = vsyncpa [#allocation6], 1 }
  0xd2   :  { %272 = vsyncpa [#allocation4], 1 }

</bundles_post_ra>
